<compile_context>
chip_gen: v7x
topology: tpu7x:2x2x1
jax: 0.10.0
libtpu: 0.0.40
codegen_flags: <defaults>
</compile_context>

<pallas_src>
import math

import jax
import jax.numpy as jnp
from jax.experimental import pallas as pl
from jax.experimental.pallas import tpu as pltpu


# ---------------------------------------------------------------------------
# Shared helpers
# ---------------------------------------------------------------------------

def _pick_copy_shape(n, flat):
    """Lane-dense copy shape for a contiguous (n, flat) slab.

    Reshaping is free (metadata only), so pick (rows, L) with L a large
    multiple of 128 and rows >= 8 when the element count allows; otherwise
    fall back to the original (n, flat).
    """
    total = n * flat
    for lane in (4096, 2048, 1024, 512, 256, 128):
        if total % lane == 0 and total // lane >= 8:
            return total // lane, lane
    return n, flat


def _gen_params():
    """(max_tile_bytes, vmem_limit_bytes), generation-aware.

    v7x has 64 MiB VMEM per TensorCore -> keep ~4x tile residency well under
    that; v5e/v6e have 128 MiB -> larger tiles are safe (and on v6e they help
    amortize per-step overhead against 1.4 TB/s HBM).
    """
    try:
        info = pltpu.get_tpu_info()
        vmem = getattr(info, "vmem_capacity_bytes", 64 * 1024 * 1024)
    except Exception:  # pragma: no cover - conservative default
        vmem = 64 * 1024 * 1024
    if vmem <= 64 * 1024 * 1024:
        # v7x-class: 6 MiB tiles, ~24 MiB resident with double-buffering.
        return 6 * 1024 * 1024, 40 * 1024 * 1024
    # v5e / v6e class (128 MiB physical): 4 MiB tiles; on v5e bigger tiles buy
    # ~nothing (HBM-bound already) but cost only a little extra residency.
    return 4 * 1024 * 1024, 64 * 1024 * 1024


# ---------------------------------------------------------------------------
# Path A (primary): chunked HBM -> HBM DMA copy, no VMEM/vreg staging
# ---------------------------------------------------------------------------

_DMA_SLOTS = 4            # outstanding DMAs
_MAX_DMA_CHUNKS = 64      # static Python unroll cap
_TARGET_CHUNK_BYTES = 8 * 1024 * 1024


def _flatten_copy_dma(x2):
    n, flat = x2.shape
    rows, lane = _pick_copy_shape(n, flat)
    xc = jnp.reshape(x2, (rows, lane))            # free
    itemsize = jnp.dtype(x2.dtype).itemsize
    row_bytes = lane * itemsize

    # Static (Python-side) chunking over rows: contiguous row ranges.
    chunk_rows = max(1, _TARGET_CHUNK_BYTES // row_bytes)
    if rows >= 2 * _DMA_SLOTS and pl.cdiv(rows, chunk_rows) < 2 * _DMA_SLOTS:
        # Ensure enough chunks to overlap multiple DMA engines.
        chunk_rows = pl.cdiv(rows, 2 * _DMA_SLOTS)
    chunk_rows = min(chunk_rows, rows)
    if pl.cdiv(rows, chunk_rows) > _MAX_DMA_CHUNKS:
        chunk_rows = pl.cdiv(rows, _MAX_DMA_CHUNKS)
    chunks = [(s, min(chunk_rows, rows - s)) for s in range(0, rows, chunk_rows)]

    def kernel(x_hbm, o_hbm, sems):
        descs = []
        for idx, (start, size) in enumerate(chunks):
            slot = idx % _DMA_SLOTS
            if idx >= _DMA_SLOTS:
                # Free this slot's semaphore before reusing it.
                descs[idx - _DMA_SLOTS].wait()
            cp = pltpu.make_async_copy(
                x_hbm.at[pl.ds(start, size)],
                o_hbm.at[pl.ds(start, size)],
                sems.at[slot],
            )
            cp.start()
            descs.append(cp)
        # Drain the (up to) _DMA_SLOTS still-outstanding copies.
        for cp in descs[max(0, len(descs) - _DMA_SLOTS):]:
            cp.wait()

    nbytes = rows * lane * itemsize
    out = pl.pallas_call(
        kernel,
        out_shape=jax.ShapeDtypeStruct((rows, lane), x2.dtype),
        in_specs=[pl.BlockSpec(memory_space=pl.ANY)],
        out_specs=pl.BlockSpec(memory_space=pl.ANY),
        scratch_shapes=[pltpu.SemaphoreType.DMA((_DMA_SLOTS,))],
        compiler_params=pltpu.CompilerParams(has_side_effects=True),
        cost_estimate=pl.CostEstimate(
            flops=0, transcendentals=0, bytes_accessed=2 * nbytes),
    )(xc)
    return jnp.reshape(out, (n, flat))            # free


# ---------------------------------------------------------------------------
# Path B (secondary): BlockSpec-pipelined VMEM copy (hardened tiling)
# ---------------------------------------------------------------------------

def _copy_kernel(x_ref, o_ref):
    o_ref[...] = x_ref[...]


def _pick_tiles(n, flat, itemsize, max_tile_bytes):
    """Block shapes that always satisfy the (8,128)/full-extent rule."""
    # Lane (last) dim: multiple of 128, or the full extent when not aligned.
    tile_f = min(flat, 4096) if flat % 128 == 0 else flat
    # Sublane dim: multiple of 8, or the full extent when not aligned.
    tile_n = min(n, 512) if n % 8 == 0 else n

    def fits():
        return tile_n * tile_f * itemsize <= max_tile_bytes

    # Shrink lane dim first (keeps stores full-lane & 128-aligned), then
    # sublane dim; only shrink when legality is preserved.
    while not fits() and flat % 128 == 0 and tile_f % 256 == 0 and tile_f > 128:
        tile_f //= 2
    while not fits() and n % 8 == 0 and tile_n % 16 == 0 and tile_n > 8:
        tile_n //= 2
    return tile_n, tile_f


def _flatten_copy_vmem(x2):
    n, flat = x2.shape
    rows, lane = _pick_copy_shape(n, flat)        # lane-dense copy shape
    xc = jnp.reshape(x2, (rows, lane))            # free
    itemsize = jnp.dtype(x2.dtype).itemsize
    max_tile_bytes, vmem_limit = _gen_params()
    tile_n, tile_f = _pick_tiles(rows, lane, itemsize, max_tile_bytes)
    grid = (pl.cdiv(rows, tile_n), pl.cdiv(lane, tile_f))

    nbytes = rows * lane * itemsize
    out = pl.pallas_call(
        _copy_kernel,
        out_shape=jax.ShapeDtypeStruct((rows, lane), x2.dtype),
        grid=grid,
        in_specs=[pl.BlockSpec((tile_n, tile_f), lambda i, j: (i, j))],
        out_specs=pl.BlockSpec((tile_n, tile_f), lambda i, j: (i, j)),
        compiler_params=pltpu.CompilerParams(
            dimension_semantics=("parallel", "parallel"),
            vmem_limit_bytes=vmem_limit,
        ),
        cost_estimate=pl.CostEstimate(
            flops=0, transcendentals=0, bytes_accessed=2 * nbytes),
    )(xc)
    return jnp.reshape(out, (n, flat))            # free


# ---------------------------------------------------------------------------
# Public wrapper — FlattenLayer.forward
# ---------------------------------------------------------------------------

def flatten_layer(x, *, force_pallas=False, method="dma"):
    """Pallas equivalent of FlattenLayer.forward: x.view(x.shape[0], -1).

    Default path: metadata-only reshape (zero HBM traffic at ANY size).
    force_pallas=True materializes the flattened array through a kernel:
      method="dma"  -> chunked HBM->HBM async-copy (no VMEM staging)
      method="vmem" -> BlockSpec-pipelined lane-dense VMEM copy
    """
    n = x.shape[0]
    flat = math.prod(x.shape[1:]) if x.ndim > 1 else 1
    x2 = jnp.reshape(x, (n, flat))                # free; same semantics as .view
    if not force_pallas:
        return x2
    if method == "dma":
        return _flatten_copy_dma(x2)
    return _flatten_copy_vmem(x2)


if __name__ == "__main__":
    key = jax.random.PRNGKey(0)
    # Small NCHW input: batch=2, channels=4, spatial=16x16 -> flat = 1024
    x = jax.random.normal(key, (2, 4, 16, 16), dtype=jnp.float32)
    y_ref = x.reshape(x.shape[0], -1)

    # Default path: free, metadata-only flatten.
    y_fast = flatten_layer(x)
    jax.block_until_ready(y_fast)
    assert y_fast.shape == (2, 4 * 16 * 16)
    assert jnp.array_equal(y_fast, y_ref)

    # Primary materializing path: chunked HBM->HBM DMA kernel.
    y_dma = flatten_layer(x, force_pallas=True, method="dma")
    jax.block_until_ready(y_dma)
    assert jnp.array_equal(y_dma, y_ref)

    # Secondary materializing path: pipelined lane-dense VMEM copy kernel.
    y_vmem = flatten_layer(x, force_pallas=True, method="vmem")
    jax.block_until_ready(y_vmem)
    assert jnp.array_equal(y_vmem, y_ref)

    print("KERNEL_OK")
</pallas_src>

<mosaic_0001>
module attributes {stable_mosaic.version = 11 : i64} {
  func.func @kernel(%arg0: memref<8x256xf32, #tpu.memory_space<any>>, %arg1: memref<8x256xf32, #tpu.memory_space<any>>, %arg2: memref<4x!tpu.dma_semaphore, #tpu.memory_space<semaphore_mem>>) attributes {dimension_semantics = [], scalar_prefetch = 0 : i64, scratch_operands = 1 : i64, tpu.core_type = #tpu.core_type<tc>} {
    %c0_i32 = arith.constant 0 : i32
    %c0_i32_0 = arith.constant 0 : i32
    %c0_i32_1 = arith.constant 0 : i32
    %0 = tpu.memref_slice %arg0[%c0_i32_0, %c0_i32_1] : memref<8x256xf32, #tpu.memory_space<any>> -> memref<1x256xf32, #tpu.memory_space<any>>
    %c0_i32_2 = arith.constant 0 : i32
    %c0_i32_3 = arith.constant 0 : i32
    %1 = tpu.memref_slice %arg1[%c0_i32_2, %c0_i32_3] : memref<8x256xf32, #tpu.memory_space<any>> -> memref<1x256xf32, #tpu.memory_space<any>>
    %2 = tpu.memref_slice %arg2[%c0_i32] : memref<4x!tpu.dma_semaphore, #tpu.memory_space<semaphore_mem>> -> memref<1x!tpu.dma_semaphore, #tpu.memory_space<semaphore_mem>>
    %3 = tpu.memref_squeeze %2 : memref<1x!tpu.dma_semaphore, #tpu.memory_space<semaphore_mem>> -> memref<!tpu.dma_semaphore, #tpu.memory_space<semaphore_mem>>
    tpu.enqueue_dma source(%0 : memref<1x256xf32, #tpu.memory_space<any>>) target(%1 : memref<1x256xf32, #tpu.memory_space<any>>) target_semaphore(%3 : memref<!tpu.dma_semaphore, #tpu.memory_space<semaphore_mem>>)
    %c1_i32 = arith.constant 1 : i32
    %c1_i32_4 = arith.constant 1 : i32
    %c0_i32_5 = arith.constant 0 : i32
    %4 = tpu.memref_slice %arg0[%c1_i32_4, %c0_i32_5] : memref<8x256xf32, #tpu.memory_space<any>> -> memref<1x256xf32, #tpu.memory_space<any>>
    %c1_i32_6 = arith.constant 1 : i32
    %c0_i32_7 = arith.constant 0 : i32
    %5 = tpu.memref_slice %arg1[%c1_i32_6, %c0_i32_7] : memref<8x256xf32, #tpu.memory_space<any>> -> memref<1x256xf32, #tpu.memory_space<any>>
    %6 = tpu.memref_slice %arg2[%c1_i32] : memref<4x!tpu.dma_semaphore, #tpu.memory_space<semaphore_mem>> -> memref<1x!tpu.dma_semaphore, #tpu.memory_space<semaphore_mem>>
    %7 = tpu.memref_squeeze %6 : memref<1x!tpu.dma_semaphore, #tpu.memory_space<semaphore_mem>> -> memref<!tpu.dma_semaphore, #tpu.memory_space<semaphore_mem>>
    tpu.enqueue_dma source(%4 : memref<1x256xf32, #tpu.memory_space<any>>) target(%5 : memref<1x256xf32, #tpu.memory_space<any>>) target_semaphore(%7 : memref<!tpu.dma_semaphore, #tpu.memory_space<semaphore_mem>>)
    %c2_i32 = arith.constant 2 : i32
    %c2_i32_8 = arith.constant 2 : i32
    %c0_i32_9 = arith.constant 0 : i32
    %8 = tpu.memref_slice %arg0[%c2_i32_8, %c0_i32_9] : memref<8x256xf32, #tpu.memory_space<any>> -> memref<1x256xf32, #tpu.memory_space<any>>
    %c2_i32_10 = arith.constant 2 : i32
    %c0_i32_11 = arith.constant 0 : i32
    %9 = tpu.memref_slice %arg1[%c2_i32_10, %c0_i32_11] : memref<8x256xf32, #tpu.memory_space<any>> -> memref<1x256xf32, #tpu.memory_space<any>>
    %10 = tpu.memref_slice %arg2[%c2_i32] : memref<4x!tpu.dma_semaphore, #tpu.memory_space<semaphore_mem>> -> memref<1x!tpu.dma_semaphore, #tpu.memory_space<semaphore_mem>>
    %11 = tpu.memref_squeeze %10 : memref<1x!tpu.dma_semaphore, #tpu.memory_space<semaphore_mem>> -> memref<!tpu.dma_semaphore, #tpu.memory_space<semaphore_mem>>
    tpu.enqueue_dma source(%8 : memref<1x256xf32, #tpu.memory_space<any>>) target(%9 : memref<1x256xf32, #tpu.memory_space<any>>) target_semaphore(%11 : memref<!tpu.dma_semaphore, #tpu.memory_space<semaphore_mem>>)
    %c3_i32 = arith.constant 3 : i32
    %c3_i32_12 = arith.constant 3 : i32
    %c0_i32_13 = arith.constant 0 : i32
    %12 = tpu.memref_slice %arg0[%c3_i32_12, %c0_i32_13] : memref<8x256xf32, #tpu.memory_space<any>> -> memref<1x256xf32, #tpu.memory_space<any>>
    %c3_i32_14 = arith.constant 3 : i32
    %c0_i32_15 = arith.constant 0 : i32
    %13 = tpu.memref_slice %arg1[%c3_i32_14, %c0_i32_15] : memref<8x256xf32, #tpu.memory_space<any>> -> memref<1x256xf32, #tpu.memory_space<any>>
    %14 = tpu.memref_slice %arg2[%c3_i32] : memref<4x!tpu.dma_semaphore, #tpu.memory_space<semaphore_mem>> -> memref<1x!tpu.dma_semaphore, #tpu.memory_space<semaphore_mem>>
    %15 = tpu.memref_squeeze %14 : memref<1x!tpu.dma_semaphore, #tpu.memory_space<semaphore_mem>> -> memref<!tpu.dma_semaphore, #tpu.memory_space<semaphore_mem>>
    tpu.enqueue_dma source(%12 : memref<1x256xf32, #tpu.memory_space<any>>) target(%13 : memref<1x256xf32, #tpu.memory_space<any>>) target_semaphore(%15 : memref<!tpu.dma_semaphore, #tpu.memory_space<semaphore_mem>>)
    %c0_i32_16 = arith.constant 0 : i32
    %c0_i32_17 = arith.constant 0 : i32
    %c0_i32_18 = arith.constant 0 : i32
    %16 = tpu.memref_slice %arg0[%c0_i32_17, %c0_i32_18] : memref<8x256xf32, #tpu.memory_space<any>> -> memref<1x256xf32, #tpu.memory_space<any>>
    %c0_i32_19 = arith.constant 0 : i32
    %c0_i32_20 = arith.constant 0 : i32
    %17 = tpu.memref_slice %arg1[%c0_i32_19, %c0_i32_20] : memref<8x256xf32, #tpu.memory_space<any>> -> memref<1x256xf32, #tpu.memory_space<any>>
    %18 = tpu.memref_slice %arg2[%c0_i32_16] : memref<4x!tpu.dma_semaphore, #tpu.memory_space<semaphore_mem>> -> memref<1x!tpu.dma_semaphore, #tpu.memory_space<semaphore_mem>>
    %19 = tpu.memref_squeeze %18 : memref<1x!tpu.dma_semaphore, #tpu.memory_space<semaphore_mem>> -> memref<!tpu.dma_semaphore, #tpu.memory_space<semaphore_mem>>
    tpu.wait_dma2 semaphore(%19 : memref<!tpu.dma_semaphore, #tpu.memory_space<semaphore_mem>>) src(%16 : memref<1x256xf32, #tpu.memory_space<any>>) dst(%17 : memref<1x256xf32, #tpu.memory_space<any>>)
    %c0_i32_21 = arith.constant 0 : i32
    %c4_i32 = arith.constant 4 : i32
    %c0_i32_22 = arith.constant 0 : i32
    %20 = tpu.memref_slice %arg0[%c4_i32, %c0_i32_22] : memref<8x256xf32, #tpu.memory_space<any>> -> memref<1x256xf32, #tpu.memory_space<any>>
    %c4_i32_23 = arith.constant 4 : i32
    %c0_i32_24 = arith.constant 0 : i32
    %21 = tpu.memref_slice %arg1[%c4_i32_23, %c0_i32_24] : memref<8x256xf32, #tpu.memory_space<any>> -> memref<1x256xf32, #tpu.memory_space<any>>
    %22 = tpu.memref_slice %arg2[%c0_i32_21] : memref<4x!tpu.dma_semaphore, #tpu.memory_space<semaphore_mem>> -> memref<1x!tpu.dma_semaphore, #tpu.memory_space<semaphore_mem>>
    %23 = tpu.memref_squeeze %22 : memref<1x!tpu.dma_semaphore, #tpu.memory_space<semaphore_mem>> -> memref<!tpu.dma_semaphore, #tpu.memory_space<semaphore_mem>>
    tpu.enqueue_dma source(%20 : memref<1x256xf32, #tpu.memory_space<any>>) target(%21 : memref<1x256xf32, #tpu.memory_space<any>>) target_semaphore(%23 : memref<!tpu.dma_semaphore, #tpu.memory_space<semaphore_mem>>)
    %c1_i32_25 = arith.constant 1 : i32
    %c1_i32_26 = arith.constant 1 : i32
    %c0_i32_27 = arith.constant 0 : i32
    %24 = tpu.memref_slice %arg0[%c1_i32_26, %c0_i32_27] : memref<8x256xf32, #tpu.memory_space<any>> -> memref<1x256xf32, #tpu.memory_space<any>>
    %c1_i32_28 = arith.constant 1 : i32
    %c0_i32_29 = arith.constant 0 : i32
    %25 = tpu.memref_slice %arg1[%c1_i32_28, %c0_i32_29] : memref<8x256xf32, #tpu.memory_space<any>> -> memref<1x256xf32, #tpu.memory_space<any>>
    %26 = tpu.memref_slice %arg2[%c1_i32_25] : memref<4x!tpu.dma_semaphore, #tpu.memory_space<semaphore_mem>> -> memref<1x!tpu.dma_semaphore, #tpu.memory_space<semaphore_mem>>
    %27 = tpu.memref_squeeze %26 : memref<1x!tpu.dma_semaphore, #tpu.memory_space<semaphore_mem>> -> memref<!tpu.dma_semaphore, #tpu.memory_space<semaphore_mem>>
    tpu.wait_dma2 semaphore(%27 : memref<!tpu.dma_semaphore, #tpu.memory_space<semaphore_mem>>) src(%24 : memref<1x256xf32, #tpu.memory_space<any>>) dst(%25 : memref<1x256xf32, #tpu.memory_space<any>>)
    %c1_i32_30 = arith.constant 1 : i32
    %c5_i32 = arith.constant 5 : i32
    %c0_i32_31 = arith.constant 0 : i32
    %28 = tpu.memref_slice %arg0[%c5_i32, %c0_i32_31] : memref<8x256xf32, #tpu.memory_space<any>> -> memref<1x256xf32, #tpu.memory_space<any>>
    %c5_i32_32 = arith.constant 5 : i32
    %c0_i32_33 = arith.constant 0 : i32
    %29 = tpu.memref_slice %arg1[%c5_i32_32, %c0_i32_33] : memref<8x256xf32, #tpu.memory_space<any>> -> memref<1x256xf32, #tpu.memory_space<any>>
    %30 = tpu.memref_slice %arg2[%c1_i32_30] : memref<4x!tpu.dma_semaphore, #tpu.memory_space<semaphore_mem>> -> memref<1x!tpu.dma_semaphore, #tpu.memory_space<semaphore_mem>>
    %31 = tpu.memref_squeeze %30 : memref<1x!tpu.dma_semaphore, #tpu.memory_space<semaphore_mem>> -> memref<!tpu.dma_semaphore, #tpu.memory_space<semaphore_mem>>
    tpu.enqueue_dma source(%28 : memref<1x256xf32, #tpu.memory_space<any>>) target(%29 : memref<1x256xf32, #tpu.memory_space<any>>) target_semaphore(%31 : memref<!tpu.dma_semaphore, #tpu.memory_space<semaphore_mem>>)
    %c2_i32_34 = arith.constant 2 : i32
    %c2_i32_35 = arith.constant 2 : i32
    %c0_i32_36 = arith.constant 0 : i32
    %32 = tpu.memref_slice %arg0[%c2_i32_35, %c0_i32_36] : memref<8x256xf32, #tpu.memory_space<any>> -> memref<1x256xf32, #tpu.memory_space<any>>
    %c2_i32_37 = arith.constant 2 : i32
    %c0_i32_38 = arith.constant 0 : i32
    %33 = tpu.memref_slice %arg1[%c2_i32_37, %c0_i32_38] : memref<8x256xf32, #tpu.memory_space<any>> -> memref<1x256xf32, #tpu.memory_space<any>>
    %34 = tpu.memref_slice %arg2[%c2_i32_34] : memref<4x!tpu.dma_semaphore, #tpu.memory_space<semaphore_mem>> -> memref<1x!tpu.dma_semaphore, #tpu.memory_space<semaphore_mem>>
    %35 = tpu.memref_squeeze %34 : memref<1x!tpu.dma_semaphore, #tpu.memory_space<semaphore_mem>> -> memref<!tpu.dma_semaphore, #tpu.memory_space<semaphore_mem>>
    tpu.wait_dma2 semaphore(%35 : memref<!tpu.dma_semaphore, #tpu.memory_space<semaphore_mem>>) src(%32 : memref<1x256xf32, #tpu.memory_space<any>>) dst(%33 : memref<1x256xf32, #tpu.memory_space<any>>)
    %c2_i32_39 = arith.constant 2 : i32
    %c6_i32 = arith.constant 6 : i32
    %c0_i32_40 = arith.constant 0 : i32
    %36 = tpu.memref_slice %arg0[%c6_i32, %c0_i32_40] : memref<8x256xf32, #tpu.memory_space<any>> -> memref<1x256xf32, #tpu.memory_space<any>>
    %c6_i32_41 = arith.constant 6 : i32
    %c0_i32_42 = arith.constant 0 : i32
    %37 = tpu.memref_slice %arg1[%c6_i32_41, %c0_i32_42] : memref<8x256xf32, #tpu.memory_space<any>> -> memref<1x256xf32, #tpu.memory_space<any>>
    %38 = tpu.memref_slice %arg2[%c2_i32_39] : memref<4x!tpu.dma_semaphore, #tpu.memory_space<semaphore_mem>> -> memref<1x!tpu.dma_semaphore, #tpu.memory_space<semaphore_mem>>
    %39 = tpu.memref_squeeze %38 : memref<1x!tpu.dma_semaphore, #tpu.memory_space<semaphore_mem>> -> memref<!tpu.dma_semaphore, #tpu.memory_space<semaphore_mem>>
    tpu.enqueue_dma source(%36 : memref<1x256xf32, #tpu.memory_space<any>>) target(%37 : memref<1x256xf32, #tpu.memory_space<any>>) target_semaphore(%39 : memref<!tpu.dma_semaphore, #tpu.memory_space<semaphore_mem>>)
    %c3_i32_43 = arith.constant 3 : i32
    %c3_i32_44 = arith.constant 3 : i32
    %c0_i32_45 = arith.constant 0 : i32
    %40 = tpu.memref_slice %arg0[%c3_i32_44, %c0_i32_45] : memref<8x256xf32, #tpu.memory_space<any>> -> memref<1x256xf32, #tpu.memory_space<any>>
    %c3_i32_46 = arith.constant 3 : i32
    %c0_i32_47 = arith.constant 0 : i32
    %41 = tpu.memref_slice %arg1[%c3_i32_46, %c0_i32_47] : memref<8x256xf32, #tpu.memory_space<any>> -> memref<1x256xf32, #tpu.memory_space<any>>
    %42 = tpu.memref_slice %arg2[%c3_i32_43] : memref<4x!tpu.dma_semaphore, #tpu.memory_space<semaphore_mem>> -> memref<1x!tpu.dma_semaphore, #tpu.memory_space<semaphore_mem>>
    %43 = tpu.memref_squeeze %42 : memref<1x!tpu.dma_semaphore, #tpu.memory_space<semaphore_mem>> -> memref<!tpu.dma_semaphore, #tpu.memory_space<semaphore_mem>>
    tpu.wait_dma2 semaphore(%43 : memref<!tpu.dma_semaphore, #tpu.memory_space<semaphore_mem>>) src(%40 : memref<1x256xf32, #tpu.memory_space<any>>) dst(%41 : memref<1x256xf32, #tpu.memory_space<any>>)
    %c3_i32_48 = arith.constant 3 : i32
    %c7_i32 = arith.constant 7 : i32
    %c0_i32_49 = arith.constant 0 : i32
    %44 = tpu.memref_slice %arg0[%c7_i32, %c0_i32_49] : memref<8x256xf32, #tpu.memory_space<any>> -> memref<1x256xf32, #tpu.memory_space<any>>
    %c7_i32_50 = arith.constant 7 : i32
    %c0_i32_51 = arith.constant 0 : i32
    %45 = tpu.memref_slice %arg1[%c7_i32_50, %c0_i32_51] : memref<8x256xf32, #tpu.memory_space<any>> -> memref<1x256xf32, #tpu.memory_space<any>>
    %46 = tpu.memref_slice %arg2[%c3_i32_48] : memref<4x!tpu.dma_semaphore, #tpu.memory_space<semaphore_mem>> -> memref<1x!tpu.dma_semaphore, #tpu.memory_space<semaphore_mem>>
    %47 = tpu.memref_squeeze %46 : memref<1x!tpu.dma_semaphore, #tpu.memory_space<semaphore_mem>> -> memref<!tpu.dma_semaphore, #tpu.memory_space<semaphore_mem>>
    tpu.enqueue_dma source(%44 : memref<1x256xf32, #tpu.memory_space<any>>) target(%45 : memref<1x256xf32, #tpu.memory_space<any>>) target_semaphore(%47 : memref<!tpu.dma_semaphore, #tpu.memory_space<semaphore_mem>>)
    %c0_i32_52 = arith.constant 0 : i32
    %c4_i32_53 = arith.constant 4 : i32
    %c0_i32_54 = arith.constant 0 : i32
    %48 = tpu.memref_slice %arg0[%c4_i32_53, %c0_i32_54] : memref<8x256xf32, #tpu.memory_space<any>> -> memref<1x256xf32, #tpu.memory_space<any>>
    %c4_i32_55 = arith.constant 4 : i32
    %c0_i32_56 = arith.constant 0 : i32
    %49 = tpu.memref_slice %arg1[%c4_i32_55, %c0_i32_56] : memref<8x256xf32, #tpu.memory_space<any>> -> memref<1x256xf32, #tpu.memory_space<any>>
    %50 = tpu.memref_slice %arg2[%c0_i32_52] : memref<4x!tpu.dma_semaphore, #tpu.memory_space<semaphore_mem>> -> memref<1x!tpu.dma_semaphore, #tpu.memory_space<semaphore_mem>>
    %51 = tpu.memref_squeeze %50 : memref<1x!tpu.dma_semaphore, #tpu.memory_space<semaphore_mem>> -> memref<!tpu.dma_semaphore, #tpu.memory_space<semaphore_mem>>
    tpu.wait_dma2 semaphore(%51 : memref<!tpu.dma_semaphore, #tpu.memory_space<semaphore_mem>>) src(%48 : memref<1x256xf32, #tpu.memory_space<any>>) dst(%49 : memref<1x256xf32, #tpu.memory_space<any>>)
    %c1_i32_57 = arith.constant 1 : i32
    %c5_i32_58 = arith.constant 5 : i32
    %c0_i32_59 = arith.constant 0 : i32
    %52 = tpu.memref_slice %arg0[%c5_i32_58, %c0_i32_59] : memref<8x256xf32, #tpu.memory_space<any>> -> memref<1x256xf32, #tpu.memory_space<any>>
    %c5_i32_60 = arith.constant 5 : i32
    %c0_i32_61 = arith.constant 0 : i32
    %53 = tpu.memref_slice %arg1[%c5_i32_60, %c0_i32_61] : memref<8x256xf32, #tpu.memory_space<any>> -> memref<1x256xf32, #tpu.memory_space<any>>
    %54 = tpu.memref_slice %arg2[%c1_i32_57] : memref<4x!tpu.dma_semaphore, #tpu.memory_space<semaphore_mem>> -> memref<1x!tpu.dma_semaphore, #tpu.memory_space<semaphore_mem>>
    %55 = tpu.memref_squeeze %54 : memref<1x!tpu.dma_semaphore, #tpu.memory_space<semaphore_mem>> -> memref<!tpu.dma_semaphore, #tpu.memory_space<semaphore_mem>>
    tpu.wait_dma2 semaphore(%55 : memref<!tpu.dma_semaphore, #tpu.memory_space<semaphore_mem>>) src(%52 : memref<1x256xf32, #tpu.memory_space<any>>) dst(%53 : memref<1x256xf32, #tpu.memory_space<any>>)
    %c2_i32_62 = arith.constant 2 : i32
    %c6_i32_63 = arith.constant 6 : i32
    %c0_i32_64 = arith.constant 0 : i32
    %56 = tpu.memref_slice %arg0[%c6_i32_63, %c0_i32_64] : memref<8x256xf32, #tpu.memory_space<any>> -> memref<1x256xf32, #tpu.memory_space<any>>
    %c6_i32_65 = arith.constant 6 : i32
    %c0_i32_66 = arith.constant 0 : i32
    %57 = tpu.memref_slice %arg1[%c6_i32_65, %c0_i32_66] : memref<8x256xf32, #tpu.memory_space<any>> -> memref<1x256xf32, #tpu.memory_space<any>>
    %58 = tpu.memref_slice %arg2[%c2_i32_62] : memref<4x!tpu.dma_semaphore, #tpu.memory_space<semaphore_mem>> -> memref<1x!tpu.dma_semaphore, #tpu.memory_space<semaphore_mem>>
    %59 = tpu.memref_squeeze %58 : memref<1x!tpu.dma_semaphore, #tpu.memory_space<semaphore_mem>> -> memref<!tpu.dma_semaphore, #tpu.memory_space<semaphore_mem>>
    tpu.wait_dma2 semaphore(%59 : memref<!tpu.dma_semaphore, #tpu.memory_space<semaphore_mem>>) src(%56 : memref<1x256xf32, #tpu.memory_space<any>>) dst(%57 : memref<1x256xf32, #tpu.memory_space<any>>)
    %c3_i32_67 = arith.constant 3 : i32
    %c7_i32_68 = arith.constant 7 : i32
    %c0_i32_69 = arith.constant 0 : i32
    %60 = tpu.memref_slice %arg0[%c7_i32_68, %c0_i32_69] : memref<8x256xf32, #tpu.memory_space<any>> -> memref<1x256xf32, #tpu.memory_space<any>>
    %c7_i32_70 = arith.constant 7 : i32
    %c0_i32_71 = arith.constant 0 : i32
    %61 = tpu.memref_slice %arg1[%c7_i32_70, %c0_i32_71] : memref<8x256xf32, #tpu.memory_space<any>> -> memref<1x256xf32, #tpu.memory_space<any>>
    %62 = tpu.memref_slice %arg2[%c3_i32_67] : memref<4x!tpu.dma_semaphore, #tpu.memory_space<semaphore_mem>> -> memref<1x!tpu.dma_semaphore, #tpu.memory_space<semaphore_mem>>
    %63 = tpu.memref_squeeze %62 : memref<1x!tpu.dma_semaphore, #tpu.memory_space<semaphore_mem>> -> memref<!tpu.dma_semaphore, #tpu.memory_space<semaphore_mem>>
    tpu.wait_dma2 semaphore(%63 : memref<!tpu.dma_semaphore, #tpu.memory_space<semaphore_mem>>) src(%60 : memref<1x256xf32, #tpu.memory_space<any>>) dst(%61 : memref<1x256xf32, #tpu.memory_space<any>>)
    return
  }
}

</mosaic_0001>

<bundles_post_ra>
// kernel: tpu_custom_call.1
= control target key start
LH: loop header
LB: loop body
LE: loop exit
PB: predicated region body
PF: predicated region fallthrough
CT: control target
= control target key end

     0   :  { %s254_s6 = smov 128   ;;  %s255_s7 = smov 1   ;;  %s367_s0 = inlined_call_operand.hbm [shape: f32[8,256], index: 0, kind: input, shape index: {}]   ;;  %s368_s1 = inlined_call_operand.hbm [shape: f32[8,256], index: 1, kind: output, shape index: {}]  }
   0x1   :  { %18 = sst [smem:[#allocation4]] %s254_s6  ;;  %s256_s8 = smov [#allocation2]  }
   0x2   :  { %20 = sst [smem:[#allocation4 + $0x1]] %s254_s6  ;;  %s257_s9 = smov [#allocation3]  }
   0x3   :  { %22 = sst [smem:[#allocation4 + $0x2]] %s255_s7  ;;  %s258_s10 = smov 0  }
   0x4   :  { %24 = dma.general %s367_s0, 32, %s368_s1, %s256_s8, %s257_s9, [#allocation4], %s258_s10, 0  }
   0x5   :  { %40 = sst [smem:[#allocation6]] %s254_s6  ;;  %s25_s17 = scalar_lea.hbm %s367_s0, 16 }
   0x6   :  { %42 = sst [smem:[#allocation6 + $0x1]] %s254_s6  ;;  %s26_s20 = scalar_lea.hbm %s368_s1, 16 }
   0x7   :  { %44 = sst [smem:[#allocation6 + $0x2]] %s255_s7  ;;  %s47_s23 = scalar_lea.hbm %s367_s0, 32 }
   0x8   :  { %s259_s24 = smov [#allocation2 + $0x1]   ;;  %s260_s25 = smov [#allocation5]  }
   0x9   :  { %46 = dma.general %s25_s17, 32, %s26_s20, %s259_s24, %s260_s25, [#allocation6], %s258_s10, 0  }
   0xa   :  { %62 = sst [smem:[#allocation8]] %s254_s6  ;;  %s48_s28 = scalar_lea.hbm %s368_s1, 32 }
   0xb   :  { %64 = sst [smem:[#allocation8 + $0x1]] %s254_s6  ;;  %s261_s29 = smov [#allocation2 + $0x2]  }
   0xc   :  { %66 = sst [smem:[#allocation8 + $0x2]] %s255_s7  ;;  %s262_s30 = smov [#allocation7]  }
   0xd   :  { %68 = dma.general %s47_s23, 32, %s48_s28, %s261_s29, %s262_s30, [#allocation8], %s258_s10, 0  }
   0xe   :  { %84 = sst [smem:[#allocation10]] %s254_s6  ;;  %s69_s4 = scalar_lea.hbm %s367_s0, 48 }
   0xf   :  { %86 = sst [smem:[#allocation10 + $0x1]] %s254_s6  ;;  %s70_s11 = scalar_lea.hbm %s368_s1, 48 }
  0x10   :  { %88 = sst [smem:[#allocation10 + $0x2]] %s255_s7  ;;  %s263_s12 = smov [#allocation2 + $0x3]  }
  0x11   :  { %s264_s13 = smov [#allocation9]  }
  0x12   :  { %90 = dma.general %s69_s4, 32, %s70_s11, %s263_s12, %s264_s13, [#allocation10], %s258_s10, 0  }
  0x13   :  { %238 = dma.done.wait [#allocation2], 32 }
  0x14   :  { %239 = vsyncadd [#allocation2], 4294967264  ;;  %s94_s16 = scalar_lea.hbm %s367_s0, 64  ;;  %s95_s19 = scalar_lea.hbm %s368_s1, 64 }
  0x15   :  { %108 = sst [smem:[#allocation12]] %s254_s6  ;;  %s265_s20 = smov [#allocation11]  }
  0x16   :  { %110 = sst [smem:[#allocation12 + $0x1]] %s254_s6 }
  0x17   :  { %112 = sst [smem:[#allocation12 + $0x2]] %s255_s7 }
  0x18   :  { %114 = dma.general %s94_s16, 32, %s95_s19, %s256_s8, %s265_s20, [#allocation12], %s258_s10, 0  }
  0x19   :  { %240 = dma.done.wait [#allocation2 + $0x1], 32 }
  0x1a   :  { %241 = vsyncadd [#allocation2 + $0x1], 4294967264  ;;  %s117_s23 = scalar_lea.hbm %s367_s0, 80  ;;  %s118_s27 = scalar_lea.hbm %s368_s1, 80 }
  0x1b   :  { %131 = sst [smem:[#allocation14]] %s254_s6  ;;  %s266_s28 = smov [#allocation13]  }
  0x1c   :  { %133 = sst [smem:[#allocation14 + $0x1]] %s254_s6 }
  0x1d   :  { %135 = sst [smem:[#allocation14 + $0x2]] %s255_s7 }
  0x1e   :  { %137 = dma.general %s117_s23, 32, %s118_s27, %s259_s24, %s266_s28, [#allocation14], %s258_s10, 0  }
  0x1f   :  { %242 = dma.done.wait [#allocation2 + $0x2], 32 }
  0x20   :  { %243 = vsyncadd [#allocation2 + $0x2], 4294967264  ;;  %s140_s2 = scalar_lea.hbm %s367_s0, 96  ;;  %s141_s5 = scalar_lea.hbm %s368_s1, 96 }
  0x21   :  { %154 = sst [smem:[#allocation16]] %s254_s6  ;;  %s267_s9 = smov [#allocation15]  }
  0x22   :  { %156 = sst [smem:[#allocation16 + $0x1]] %s254_s6 }
  0x23   :  { %158 = sst [smem:[#allocation16 + $0x2]] %s255_s7 }
  0x24   :  { %160 = dma.general %s140_s2, 32, %s141_s5, %s261_s29, %s267_s9, [#allocation16], %s258_s10, 0  }
  0x25   :  { %244 = dma.done.wait [#allocation2 + $0x3], 32 }
  0x26   :  { %245 = vsyncadd [#allocation2 + $0x3], 4294967264  ;;  %s163_s13 = scalar_lea.hbm %s367_s0, 112  ;;  %s164_s16 = scalar_lea.hbm %s368_s1, 112 }
  0x27   :  { %177 = sst [smem:[#allocation18]] %s254_s6  ;;  %s268_s17 = smov [#allocation17]  }
  0x28   :  { %179 = sst [smem:[#allocation18 + $0x1]] %s254_s6 }
  0x29   :  { %181 = sst [smem:[#allocation18 + $0x2]] %s255_s7 }
  0x2a   :  { %183 = dma.general %s163_s13, 32, %s164_s16, %s263_s12, %s268_s17, [#allocation18], %s258_s10, 0  }
  0x2b   :  { %246 = dma.done.wait [#allocation2], 32 }
  0x2c   :  { %247 = vsyncadd [#allocation2], 4294967264 }
  0x2d   :  { %248 = dma.done.wait [#allocation2 + $0x1], 32 }
  0x2e   :  { %249 = vsyncadd [#allocation2 + $0x1], 4294967264 }
  0x2f   :  { %250 = dma.done.wait [#allocation2 + $0x2], 32 }
  0x30   :  { %251 = vsyncadd [#allocation2 + $0x2], 4294967264 }
  0x31   :  { %252 = dma.done.wait [#allocation2 + $0x3], 32 }
  0x32   :  { %253 = vsyncadd [#allocation2 + $0x3], 4294967264 }
  0x33   :  { %192 = vsyncmov [#allocation2] }
  0x36   :  { %s193_s0 = vpop.sfrf %192 }
  0x37   :  { %p219_p0 = scmp.ne.s32.totalorder %s193_s0, 0 }
  0x39   :  { %197 = shalt.err (%p219_p0)  }
  0x3a   :  { %199 = vsyncmov [#allocation2 + $0x1] }
  0x3d   :  { %s200_s1 = vpop.sfrf %199 }
  0x3e   :  { %p220_p1 = scmp.ne.s32.totalorder %s200_s1, 0 }
  0x40   :  { %204 = shalt.err (%p220_p1)  }
  0x41   :  { %206 = vsyncmov [#allocation2 + $0x2] }
  0x44   :  { %s207_s6 = vpop.sfrf %206 }
  0x45   :  { %p221_p2 = scmp.ne.s32.totalorder %s207_s6, 0 }
  0x47   :  { %211 = shalt.err (%p221_p2)  }
  0x48   :  { %213 = vsyncmov [#allocation2 + $0x3] }
  0x4b   :  { %s214_s7 = vpop.sfrf %213 }
  0x4c   :  { %p222_p3 = scmp.ne.s32.totalorder %s214_s7, 0 }
  0x4e   :  { %218 = shalt.err (%p222_p3)  }

</bundles_post_ra>
